<compile_context>
chip_gen: v7x
topology: tpu7x:2x2x1
jax: 0.10.0
libtpu: 0.0.40
codegen_flags: <defaults>
</compile_context>

<pallas_src>
import functools
import math

import jax
import jax.numpy as jnp
from jax.experimental import pallas as pl
from jax.experimental.pallas import tpu as pltpu


# ---------------------------------------------------------------------------
# hardware-aware configuration
# ---------------------------------------------------------------------------

def _round_up(x, m):
    return (x + m - 1) // m * m


def _vmem_capacity_bytes():
    try:
        return int(pltpu.get_tpu_info().vmem_capacity_bytes)
    except Exception:
        return 64 << 20            # conservative: assume v7x (64 MiB / TensorCore)


def _select_config():
    vmem = _vmem_capacity_bytes()
    if vmem >= (100 << 20):        # v5e / v6e / v5p: 128 MiB physical VMEM
        return dict(tm=512, ti=1024, vmem_limit=96 << 20)
    # v7x (or unknown): 64 MiB physical VMEM -> smaller tiles, leave headroom
    # for Mosaic internal scratch.  (For B=1 on v7x, tm=128 gives a more even
    # 2-TensorCore split of the parallel token axis.)
    return dict(tm=256, ti=512, vmem_limit=48 << 20)


_CFG = _select_config()


def _pick_tile(m, want):
    """Largest multiple of 8 that divides m and is <= want (m is a multiple of 8)."""
    t = max(8, min((want // 8) * 8, m))
    while m % t:
        t -= 8
    return t


# ---------------------------------------------------------------------------
# math helpers (always f32)
# ---------------------------------------------------------------------------

def _gelu_tanh_f32(x):
    # matches torch.nn.functional.gelu(x, approximate='tanh'), computed in f32
    c = jnp.float32(math.sqrt(2.0 / math.pi))
    return jnp.float32(0.5) * x * (
        jnp.float32(1.0) + jnp.tanh(c * (x + jnp.float32(0.044715) * x * x * x)))


def _layernorm_f32(x_f32, gamma_f32, beta_f32, eps):
    mean = jnp.mean(x_f32, axis=-1, keepdims=True)
    var = jnp.mean(jnp.square(x_f32 - mean), axis=-1, keepdims=True)
    xn = (x_f32 - mean) * jax.lax.rsqrt(var + jnp.float32(eps))
    return xn * gamma_f32 + beta_f32


# ---------------------------------------------------------------------------
# kernel bodies
# ---------------------------------------------------------------------------

def _embed_kernel(x_ref, w_ref, b_ref, pos_ref, o_ref):
    # o = patches @ W + b + pos   (pos tile selected by index_map, no broadcast)
    y = jnp.dot(x_ref[...], w_ref[...], preferred_element_type=jnp.float32)
    y = y + b_ref[...].astype(jnp.float32) + pos_ref[...].astype(jnp.float32)
    o_ref[...] = y.astype(o_ref.dtype)


def _ln_qkv_kernel(x_ref, g_ref, b_ref, w_ref, bias_ref, o_ref, xn_scratch, *, eps):
    # LayerNorm computed once per token tile (j == 0), cached in VMEM scratch;
    # the fused [D, 3D] QKV weight is tiled along its output dim on grid axis 1.
    j = pl.program_id(1)

    @pl.when(j == 0)
    def _():
        xn_scratch[...] = _layernorm_f32(x_ref[...].astype(jnp.float32),
                                         g_ref[...].astype(jnp.float32),
                                         b_ref[...].astype(jnp.float32), eps)

    xn = xn_scratch[...].astype(x_ref.dtype)           # native-dtype MXU operand
    y = jnp.dot(xn, w_ref[...], preferred_element_type=jnp.float32)
    o_ref[...] = (y + bias_ref[...].astype(jnp.float32)).astype(o_ref.dtype)


def _attn_core_kernel(q_ref, k_ref, v_ref, o_ref, *, scale, valid_len):
    # full-sequence attention for a group of (batch, head) pairs.
    q = q_ref[...] * scale                              # fold 1/sqrt(Dh) into q (S*Dh work)
    s = jnp.einsum("bqd,bkd->bqk", q, k_ref[...],
                   preferred_element_type=jnp.float32)
    kv_len = s.shape[-1]
    if valid_len < kv_len:                              # mask padded key positions
        col = jax.lax.broadcasted_iota(jnp.int32, (1, 1, kv_len), 2)
        s = jnp.where(col < valid_len, s, jnp.float32(-1e30))
    s = s - jnp.max(s, axis=-1, keepdims=True)
    p = jnp.exp(s)                                      # softmax in f32 (as torch)
    p = p * pl.reciprocal(jnp.sum(p, axis=-1, keepdims=True), approx=True)
    o = jnp.einsum("bqk,bkd->bqd", p.astype(v_ref.dtype), v_ref[...],
                   preferred_element_type=jnp.float32)
    o_ref[...] = o.astype(o_ref.dtype)


def _linear_residual_kernel(x_ref, res_ref, w_ref, b_ref, o_ref):
    # o = res + x @ W + b   (native-dtype operands, f32 accumulate)
    y = jnp.dot(x_ref[...], w_ref[...], preferred_element_type=jnp.float32)
    y = y + b_ref[...].astype(jnp.float32) + res_ref[...].astype(jnp.float32)
    o_ref[...] = y.astype(o_ref.dtype)


def _ln_mlp_residual_kernel(x_ref, g_ref, bta_ref, w1_ref, b1_ref, w2_ref, b2_ref,
                            o_ref, xn_scratch, acc_scratch, *, eps):
    # out = x + fc2(gelu_tanh(fc1(LN(x))))   with the intermediate dim tiled on
    # grid axis 1 and accumulated in an f32 VMEM scratch.
    k = pl.program_id(1)

    @pl.when(k == 0)
    def _():
        xn_scratch[...] = _layernorm_f32(x_ref[...].astype(jnp.float32),
                                         g_ref[...].astype(jnp.float32),
                                         bta_ref[...].astype(jnp.float32), eps)
        acc_scratch[...] = jnp.zeros_like(acc_scratch)

    xn = xn_scratch[...].astype(x_ref.dtype)            # native-dtype MXU operand
    h = jnp.dot(xn, w1_ref[...], preferred_element_type=jnp.float32)
    h = _gelu_tanh_f32(h + b1_ref[...].astype(jnp.float32))   # GELU in f32
    acc_scratch[...] += jnp.dot(h.astype(w2_ref.dtype), w2_ref[...],
                                preferred_element_type=jnp.float32)

    @pl.when(k == pl.num_programs(1) - 1)
    def _():
        y = acc_scratch[...] + b2_ref[...].astype(jnp.float32) \
            + x_ref[...].astype(jnp.float32)             # fused residual add
        o_ref[...] = y.astype(o_ref.dtype)


def _layernorm_kernel(x_ref, g_ref, b_ref, o_ref, *, eps):
    o_ref[...] = _layernorm_f32(x_ref[...].astype(jnp.float32),
                                g_ref[...].astype(jnp.float32),
                                b_ref[...].astype(jnp.float32),
                                eps).astype(o_ref.dtype)


# ---------------------------------------------------------------------------
# pallas_call wrappers (all operate on flat, pre-padded [M, F] activations)
# ---------------------------------------------------------------------------

@functools.partial(jax.jit, static_argnames=("blocks_per_image", "tm", "vmem_limit"))
def patch_embed(patches, pos, w, b, *, blocks_per_image, tm, vmem_limit):
    M, CPP = patches.shape
    D = w.shape[1]
    bpi = blocks_per_image
    pos_map = (lambda i: (0, 0)) if bpi == 1 else (lambda i: (i % bpi, 0))
    return pl.pallas_call(
        _embed_kernel,
        out_shape=jax.ShapeDtypeStruct((M, D), patches.dtype),
        grid_spec=pltpu.PrefetchScalarGridSpec(
            num_scalar_prefetch=0,
            grid=(M // tm,),
            in_specs=[
                pl.BlockSpec((tm, CPP), lambda i: (i, 0)),
                pl.BlockSpec((CPP, D), lambda i: (0, 0)),
                pl.BlockSpec((1, D), lambda i: (0, 0)),
                pl.BlockSpec((tm, D), pos_map),           # positional table tile
            ],
            out_specs=pl.BlockSpec((tm, D), lambda i: (i, 0)),
        ),
        compiler_params=pltpu.CompilerParams(
            dimension_semantics=("parallel",), vmem_limit_bytes=vmem_limit),
    )(patches, w, b.reshape(1, D), pos)


@functools.partial(jax.jit, static_argnames=("eps", "tm", "vmem_limit"))
def ln_qkv(x, gamma, beta, wqkv, bqkv, *, eps, tm, vmem_limit):
    """qkv = LayerNorm(x) @ Wqkv + bqkv  for x: [M, D], Wqkv: [D, 3D]."""
    M, D = x.shape
    O = wqkv.shape[1]
    tm = _pick_tile(M, tm)
    # Tile the fused output dim when lane-aligned (real SigLIP: D % 128 == 0)
    # so only one weight slice is resident per step; otherwise use the full 3D.
    tn = D if D % 128 == 0 else O
    grid = (M // tm, O // tn)
    out = pl.pallas_call(
        functools.partial(_ln_qkv_kernel, eps=eps),
        out_shape=jax.ShapeDtypeStruct((M, O), x.dtype),
        grid_spec=pltpu.PrefetchScalarGridSpec(
            num_scalar_prefetch=0,
            grid=grid,
            in_specs=[
                pl.BlockSpec((tm, D), lambda i, j: (i, 0)),
                pl.BlockSpec((1, D), lambda i, j: (0, 0)),
                pl.BlockSpec((1, D), lambda i, j: (0, 0)),
                pl.BlockSpec((D, tn), lambda i, j: (0, j)),
                pl.BlockSpec((1, tn), lambda i, j: (0, j)),
            ],
            out_specs=pl.BlockSpec((tm, tn), lambda i, j: (i, j)),
            scratch_shapes=[pltpu.VMEM((tm, D), jnp.float32)],   # cached LN(x)
        ),
        compiler_params=pltpu.CompilerParams(
            dimension_semantics=("parallel", "arbitrary"),
            vmem_limit_bytes=vmem_limit),
    )(x, gamma.reshape(1, D), beta.reshape(1, D), wqkv, bqkv.reshape(1, O))
    return out


@functools.partial(jax.jit,
                   static_argnames=("num_heads", "batch", "seq_len", "valid_len",
                                    "vmem_limit"))
def mha_core(qkv, *, num_heads, batch, seq_len, valid_len, vmem_limit):
    """softmax(q k^T / sqrt(Dh)) v ; qkv: [B*S, 3D] -> [B*S, D]."""
    M, threeD = qkv.shape
    D = threeD // 3
    B, S, H = batch, seq_len, num_heads
    Dh = D // H
    scale = 1.0 / math.sqrt(Dh)

    # One fused head-split transpose instead of three separate q/k/v transposes.
    qkv = qkv.reshape(B, S, 3, H, Dh).transpose(2, 0, 3, 1, 4).reshape(3, B * H, S, Dh)
    q, k, v = qkv[0], qkv[1], qkv[2]

    # Batch several (batch, head) pairs per grid step: amortizes per-step launch
    # overhead while keeping the f32 scores block (g * S * S * 4B) within VMEM.
    g = 1
    for cand in range(1, min(16, B * H) + 1):
        if (B * H) % cand == 0 and cand * S * S * 4 <= (12 << 20):
            g = cand

    spec = pl.BlockSpec((g, S, Dh), lambda i: (i, 0, 0))
    o = pl.pallas_call(
        functools.partial(_attn_core_kernel, scale=scale, valid_len=valid_len),
        out_shape=jax.ShapeDtypeStruct((B * H, S, Dh), q.dtype),
        grid_spec=pltpu.PrefetchScalarGridSpec(
            num_scalar_prefetch=0,
            grid=((B * H) // g,),
            in_specs=[spec, spec, spec],
            out_specs=spec,
        ),
        compiler_params=pltpu.CompilerParams(
            dimension_semantics=("parallel",), vmem_limit_bytes=vmem_limit),
    )(q, k, v)
    return o.reshape(B, H, S, Dh).transpose(0, 2, 1, 3).reshape(M, D)


@functools.partial(jax.jit, static_argnames=("tm", "vmem_limit"))
def linear_residual(x, res, w, b, *, tm, vmem_limit):
    """res + x @ w + b;  x: [M, Din], res: [M, Dout], w: [Din, Dout]."""
    M, Din = x.shape
    Dout = w.shape[1]
    tm = _pick_tile(M, tm)
    return pl.pallas_call(
        _linear_residual_kernel,
        out_shape=jax.ShapeDtypeStruct((M, Dout), res.dtype),
        grid_spec=pltpu.PrefetchScalarGridSpec(
            num_scalar_prefetch=0,
            grid=(M // tm,),
            in_specs=[
                pl.BlockSpec((tm, Din), lambda i: (i, 0)),
                pl.BlockSpec((tm, Dout), lambda i: (i, 0)),
                pl.BlockSpec((Din, Dout), lambda i: (0, 0)),
                pl.BlockSpec((1, Dout), lambda i: (0, 0)),
            ],
            out_specs=pl.BlockSpec((tm, Dout), lambda i: (i, 0)),
        ),
        compiler_params=pltpu.CompilerParams(
            dimension_semantics=("parallel",), vmem_limit_bytes=vmem_limit),
    )(x, res, w, b.reshape(1, Dout))


@functools.partial(jax.jit, static_argnames=("eps", "tm", "ti", "vmem_limit"))
def ln_mlp_residual(x, gamma, beta, w1, b1, w2, b2, *, eps, tm, ti, vmem_limit):
    """x + fc2(gelu_tanh(fc1(LayerNorm(x))))  for x: [M, D]."""
    M, D = x.shape
    Ip = w1.shape[1]                   # already padded to a multiple of ti
    tm = _pick_tile(M, tm)
    if Ip <= ti:
        ti_eff = Ip
    elif Ip % ti == 0:
        ti_eff = ti
    else:                              # fallback: largest 128-multiple divisor
        ti_eff = Ip
        for cand in range(ti, 127, -128):
            if Ip % cand == 0:
                ti_eff = cand
                break
    grid = (M // tm, Ip // ti_eff)

    itemsize = jnp.dtype(x.dtype).itemsize
    cost = pl.CostEstimate(
        flops=4 * M * D * Ip,                       # fc1 + fc2 matmuls
        transcendentals=M * Ip,                     # tanh in GELU
        bytes_accessed=(3 * M * D + w1.size + w2.size
                        + b1.size + b2.size + gamma.size + beta.size) * itemsize,
    )

    out = pl.pallas_call(
        functools.partial(_ln_mlp_residual_kernel, eps=eps),
        out_shape=jax.ShapeDtypeStruct((M, D), x.dtype),
        grid_spec=pltpu.PrefetchScalarGridSpec(
            num_scalar_prefetch=0,
            grid=grid,
            in_specs=[
                pl.BlockSpec((tm, D), lambda i, k: (i, 0)),      # x / residual
                pl.BlockSpec((1, D), lambda i, k: (0, 0)),       # ln2 gamma
                pl.BlockSpec((1, D), lambda i, k: (0, 0)),       # ln2 beta
                pl.BlockSpec((D, ti_eff), lambda i, k: (0, k)),  # W1 slice
                pl.BlockSpec((1, ti_eff), lambda i, k: (0, k)),  # b1 slice
                pl.BlockSpec((ti_eff, D), lambda i, k: (k, 0)),  # W2 slice
                pl.BlockSpec((1, D), lambda i, k: (0, 0)),       # b2
            ],
            out_specs=pl.BlockSpec((tm, D), lambda i, k: (i, 0)),
            scratch_shapes=[
                pltpu.VMEM((tm, D), jnp.float32),   # LayerNorm(x) (computed once)
                pltpu.VMEM((tm, D), jnp.float32),   # fc2 accumulator
            ],
        ),
        compiler_params=pltpu.CompilerParams(
            dimension_semantics=("parallel", "arbitrary"),
            vmem_limit_bytes=vmem_limit),
        cost_estimate=cost,
    )(x, gamma.reshape(1, D), beta.reshape(1, D),
      w1, b1.reshape(1, Ip), w2, b2.reshape(1, D))
    return out


@functools.partial(jax.jit, static_argnames=("eps", "tm", "vmem_limit"))
def layer_norm(x, gamma, beta, *, eps, tm, vmem_limit):
    M, D = x.shape
    tm = _pick_tile(M, tm)
    return pl.pallas_call(
        functools.partial(_layernorm_kernel, eps=eps),
        out_shape=jax.ShapeDtypeStruct((M, D), x.dtype),
        grid_spec=pltpu.PrefetchScalarGridSpec(
            num_scalar_prefetch=0,
            grid=(M // tm,),
            in_specs=[
                pl.BlockSpec((tm, D), lambda i: (i, 0)),
                pl.BlockSpec((1, D), lambda i: (0, 0)),
                pl.BlockSpec((1, D), lambda i: (0, 0)),
            ],
            out_specs=pl.BlockSpec((tm, D), lambda i: (i, 0)),
        ),
        compiler_params=pltpu.CompilerParams(
            dimension_semantics=("parallel",), vmem_limit_bytes=vmem_limit),
    )(x, gamma.reshape(1, D), beta.reshape(1, D))


# ---------------------------------------------------------------------------
# one-time weight preprocessing + full SiglipTransformer forward
# ---------------------------------------------------------------------------

def prepare_params(params, *, ti=_CFG["ti"]):
    """Fuse wq/wk/wv into one [D, 3D] weight and zero-pad the MLP intermediate
    dim to a multiple of the ti tile (gelu(0) @ 0 contributes nothing)."""
    prepped = {
        "patch_w": params["patch_w"], "patch_b": params["patch_b"],
        "pos_emb": params["pos_emb"],
        "post_ln_g": params["post_ln_g"], "post_ln_b": params["post_ln_b"],
        "layers": [],
    }
    for lp in params["layers"]:
        I = lp["w1"].shape[1]
        Ip = I if I <= ti else _round_up(I, ti)
        w1, b1, w2 = lp["w1"], lp["b1"], lp["w2"]
        if Ip != I:
            w1 = jnp.pad(w1, ((0, 0), (0, Ip - I)))
            b1 = jnp.pad(b1, ((0, Ip - I),))
            w2 = jnp.pad(w2, ((0, Ip - I), (0, 0)))
        prepped["layers"].append({
            "ln1_g": lp["ln1_g"], "ln1_b": lp["ln1_b"],
            "wqkv": jnp.concatenate([lp["wq"], lp["wk"], lp["wv"]], axis=1),
            "bqkv": jnp.concatenate([lp["bq"], lp["bk"], lp["bv"]]),
            "wo": lp["wo"], "bo": lp["bo"],
            "ln2_g": lp["ln2_g"], "ln2_b": lp["ln2_b"],
            "w1": w1, "b1": b1, "w2": w2, "b2": lp["b2"],
        })
    return prepped


def siglip_transformer(pixel_values, prepared, *, patch_size, num_heads, eps,
                       tm=_CFG["tm"], ti=_CFG["ti"], vmem_limit=_CFG["vmem_limit"]):
    """pixel_values: [B, C, H, W]  ->  [B, num_patches, hidden]."""
    B, C, Himg, Wimg = pixel_values.shape
    P = patch_size
    nh, nw = Himg // P, Wimg // P
    N = nh * nw
    D = prepared["patch_w"].shape[1]

    # SiglipVisionEmbeddings: conv(kernel=stride=P) == patchify + linear.
    patches = pixel_values.reshape(B, C, nh, P, nw, P)
    patches = patches.transpose(0, 2, 4, 1, 3, 5).reshape(B, N, C * P * P)

    # Pad the sequence dim ONCE; the whole encoder then runs on a flat,
    # tile-aligned [B*Np, D] layout with no per-call pad/slice copies.
    pad_gran = min(256, _round_up(N, 8))
    Np = _round_up(N, pad_gran)
    if Np != N:
        patches = jnp.pad(patches, ((0, 0), (0, Np - N), (0, 0)))
        pos = jnp.pad(prepared["pos_emb"], ((0, Np - N), (0, 0)))
    else:
        pos = prepared["pos_emb"]
    M = B * Np
    patches = patches.reshape(M, C * P * P)

    tm_embed = _pick_tile(Np, tm)              # must divide Np for the pos map
    h = patch_embed(patches, pos, prepared["patch_w"], prepared["patch_b"],
                    blocks_per_image=Np // tm_embed, tm=tm_embed,
                    vmem_limit=vmem_limit)

    # SiglipEncoder
    for lp in prepared["layers"]:
        qkv = ln_qkv(h, lp["ln1_g"], lp["ln1_b"], lp["wqkv"], lp["bqkv"],
                     eps=eps, tm=tm, vmem_limit=vmem_limit)
        attn = mha_core(qkv, num_heads=num_heads, batch=B, seq_len=Np,
                        valid_len=N, vmem_limit=vmem_limit)   # dropout p=0 -> identity
        h = linear_residual(attn, h, lp["wo"], lp["bo"],
                            tm=tm, vmem_limit=vmem_limit)      # out-proj + residual
        h = ln_mlp_residual(h, lp["ln2_g"], lp["ln2_b"],
                            lp["w1"], lp["b1"], lp["w2"], lp["b2"],
                            eps=eps, tm=tm, ti=ti, vmem_limit=vmem_limit)

    # post_layernorm, then drop the sequence padding once at the very end.
    h = layer_norm(h, prepared["post_ln_g"], prepared["post_ln_b"],
                   eps=eps, tm=tm, vmem_limit=vmem_limit)
    h = h.reshape(B, Np, D)
    return h[:, :N, :] if Np != N else h


# ---------------------------------------------------------------------------
# pure-JAX reference (mirrors the torch module) for the self-check
# ---------------------------------------------------------------------------

def _ref_layernorm(x, g, b, eps):
    xf = x.astype(jnp.float32)
    mean = jnp.mean(xf, axis=-1, keepdims=True)
    var = jnp.mean(jnp.square(xf - mean), axis=-1, keepdims=True)
    return (((xf - mean) * jax.lax.rsqrt(var + eps)) * g + b).astype(x.dtype)


def siglip_transformer_reference(pixel_values, params, *, patch_size, num_heads, eps):
    HI = jax.lax.Precision.HIGHEST
    B, C, Himg, Wimg = pixel_values.shape
    P = patch_size
    nh, nw = Himg // P, Wimg // P
    N = nh * nw
    D = params["patch_w"].shape[1]
    patches = pixel_values.reshape(B, C, nh, P, nw, P)
    patches = patches.transpose(0, 2, 4, 1, 3, 5).reshape(B, N, C * P * P)
    h = jnp.matmul(patches, params["patch_w"], precision=HI) + params["patch_b"] \
        + params["pos_emb"][None]

    H = num_heads
    Dh = D // H
    scale = 1.0 / math.sqrt(Dh)
    for lp in params["layers"]:
        xn = _ref_layernorm(h, lp["ln1_g"], lp["ln1_b"], eps)
        q = jnp.matmul(xn, lp["wq"], precision=HI) + lp["bq"]
        k = jnp.matmul(xn, lp["wk"], precision=HI) + lp["bk"]
        v = jnp.matmul(xn, lp["wv"], precision=HI) + lp["bv"]
        qh = q.reshape(B, N, H, Dh).transpose(0, 2, 1, 3)
        kh = k.reshape(B, N, H, Dh).transpose(0, 2, 1, 3)
        vh = v.reshape(B, N, H, Dh).transpose(0, 2, 1, 3)
        s = jnp.einsum("bhqd,bhkd->bhqk", qh, kh, precision=HI) * scale
        p = jax.nn.softmax(s.astype(jnp.float32), axis=-1).astype(q.dtype)
        o = jnp.einsum("bhqk,bhkd->bhqd", p, vh, precision=HI)
        o = o.transpose(0, 2, 1, 3).reshape(B, N, D)
        h = h + jnp.matmul(o, lp["wo"], precision=HI) + lp["bo"]
        xn2 = _ref_layernorm(h, lp["ln2_g"], lp["ln2_b"], eps)
        f = jnp.matmul(xn2, lp["w1"], precision=HI) + lp["b1"]
        f = _gelu_tanh_f32(f.astype(jnp.float32)).astype(h.dtype)
        h = h + jnp.matmul(f, lp["w2"], precision=HI) + lp["b2"]
    return _ref_layernorm(h, params["post_ln_g"], params["post_ln_b"], eps)


# ---------------------------------------------------------------------------
# demo / self-check
# ---------------------------------------------------------------------------

if __name__ == "__main__":
    batch = 2
    # image 24 / patch 8 -> 9 patches per image: exercises the sequence-padding
    # + key-masking path (Np = 16 > N = 9) as well as the unpadded kernels.
    image_size, patch_size, num_channels = 24, 8, 3
    hidden_size, intermediate_size = 32, 64
    num_layers, num_heads = 2, 4
    eps = 1e-6
    num_patches = (image_size // patch_size) ** 2

    keys = iter(jax.random.split(jax.random.PRNGKey(0), 64))

    def normal(shape, scale=0.02):
        return scale * jax.random.normal(next(keys), shape, dtype=jnp.float32)

    pixels = jax.random.normal(next(keys),
                               (batch, num_channels, image_size, image_size),
                               dtype=jnp.float32)

    params = {
        "patch_w": normal((num_channels * patch_size * patch_size, hidden_size)),
        "patch_b": normal((hidden_size,)),
        "pos_emb": normal((num_patches, hidden_size)),
        "post_ln_g": 1.0 + normal((hidden_size,)),
        "post_ln_b": normal((hidden_size,)),
        "layers": [],
    }
    for _ in range(num_layers):
        params["layers"].append({
            "ln1_g": 1.0 + normal((hidden_size,)),
            "ln1_b": normal((hidden_size,)),
            "wq": normal((hidden_size, hidden_size)), "bq": normal((hidden_size,)),
            "wk": normal((hidden_size, hidden_size)), "bk": normal((hidden_size,)),
            "wv": normal((hidden_size, hidden_size)), "bv": normal((hidden_size,)),
            "wo": normal((hidden_size, hidden_size)), "bo": normal((hidden_size,)),
            "ln2_g": 1.0 + normal((hidden_size,)),
            "ln2_b": normal((hidden_size,)),
            "w1": normal((hidden_size, intermediate_size)),
            "b1": normal((intermediate_size,)),
            "w2": normal((intermediate_size, hidden_size)),
            "b2": normal((hidden_size,)),
        })

    # One-time weight prep (QKV fusion + MLP intermediate-dim padding).
    # For production, cast params to bf16 here; the kernels accumulate in f32.
    prepared = prepare_params(params)

    out = siglip_transformer(pixels, prepared,
                             patch_size=patch_size, num_heads=num_heads, eps=eps)
    out = jax.block_until_ready(out)

    ref = siglip_transformer_reference(pixels, params,
                                       patch_size=patch_size, num_heads=num_heads,
                                       eps=eps)
    ref = jax.block_until_ready(ref)

    assert out.shape == (batch, num_patches, hidden_size)
    # f32 matmuls on the MXU use a bf16-pass decomposition and softmax uses the
    # EUP approximate reciprocal, so allow a small tolerance.
    assert jnp.allclose(out, ref, atol=5e-3, rtol=5e-3), \
        float(jnp.max(jnp.abs(out - ref)))

    print("KERNEL_OK")
</pallas_src>

<mosaic_0001>
module attributes {stable_mosaic.version = 11 : i64} {
  func.func @_embed_kernel(%arg0: i32, %arg1: memref<16x192xf32, #tpu.memory_space<vmem>>, %arg2: memref<192x32xf32, #tpu.memory_space<vmem>>, %arg3: memref<1x32xf32, #tpu.memory_space<vmem>>, %arg4: memref<16x32xf32, #tpu.memory_space<vmem>>, %arg5: memref<16x32xf32, #tpu.memory_space<vmem>>) attributes {dimension_semantics = [#tpu.dimension_semantics<parallel>], iteration_bounds = array<i64: 2>, scalar_prefetch = 0 : i64, scratch_operands = 0 : i64, tpu.core_type = #tpu.core_type<tc>, window_params = [{transform_indices = @transform_0, window_bounds = array<i64: 16, 192>}, {pipeline_mode = #tpu.pipeline_mode<synchronous>, transform_indices = @transform_1, window_bounds = array<i64: 192, 32>}, {pipeline_mode = #tpu.pipeline_mode<synchronous>, transform_indices = @transform_2, window_bounds = array<i64: 1, 32>}, {pipeline_mode = #tpu.pipeline_mode<synchronous>, transform_indices = @transform_3, window_bounds = array<i64: 16, 32>}, {transform_indices = @transform_4, window_bounds = array<i64: 16, 32>}]} {
    %c0 = arith.constant 0 : index
    %c0_0 = arith.constant 0 : index
    %0 = vector.load %arg1[%c0, %c0_0] : memref<16x192xf32, #tpu.memory_space<vmem>>, vector<16x192xf32>
    %c0_1 = arith.constant 0 : index
    %c0_2 = arith.constant 0 : index
    %1 = vector.load %arg2[%c0_1, %c0_2] : memref<192x32xf32, #tpu.memory_space<vmem>>, vector<192x32xf32>
    %cst = arith.constant dense<0.000000e+00> : vector<16x32xf32>
    %2 = tpu.matmul %0, %1, %cst {dimension_numbers = #tpu.dot_dimension_numbers<[1], [0], [0], [1], [0, 0, 1, 1], [], []>} : vector<16x192xf32>, vector<192x32xf32>, vector<16x32xf32> -> vector<16x32xf32>
    %c0_3 = arith.constant 0 : index
    %c0_4 = arith.constant 0 : index
    %3 = vector.load %arg3[%c0_3, %c0_4] : memref<1x32xf32, #tpu.memory_space<vmem>>, vector<1x32xf32>
    %4 = vector.broadcast %3 : vector<1x32xf32> to vector<16x32xf32>
    %5 = arith.addf %2, %4 : vector<16x32xf32>
    %c0_5 = arith.constant 0 : index
    %c0_6 = arith.constant 0 : index
    %6 = vector.load %arg4[%c0_5, %c0_6] : memref<16x32xf32, #tpu.memory_space<vmem>>, vector<16x32xf32>
    %7 = arith.addf %5, %6 : vector<16x32xf32>
    %c0_7 = arith.constant 0 : index
    %c0_8 = arith.constant 0 : index
    %8 = vector.load %arg5[%c0_7, %c0_8] : memref<16x32xf32, #tpu.memory_space<vmem>>, vector<16x32xf32>
    tpu.vector_store %arg5[%c0_7, %c0_8], %7 {strides = array<i32>} : memref<16x32xf32, #tpu.memory_space<vmem>>, vector<16x32xf32>,
    return
  }
  func.func @transform_0(%arg0: i32) -> (i32, i32) {
    %c0_i32 = arith.constant 0 : i32
    %c0_i32_0 = arith.constant 0 : i32
    return %arg0, %c0_i32 : i32, i32
  }
  func.func @transform_1(%arg0: i32) -> (i32, i32) {
    %c0_i32 = arith.constant 0 : i32
    %c0_i32_0 = arith.constant 0 : i32
    %c0_i32_1 = arith.constant 0 : i32
    return %c0_i32, %c0_i32_0 : i32, i32
  }
  func.func @transform_2(%arg0: i32) -> (i32, i32) {
    %c0_i32 = arith.constant 0 : i32
    %c0_i32_0 = arith.constant 0 : i32
    %c0_i32_1 = arith.constant 0 : i32
    return %c0_i32, %c0_i32_0 : i32, i32
  }
  func.func @transform_3(%arg0: i32) -> (i32, i32) {
    %c0_i32 = arith.constant 0 : i32
    %c0_i32_0 = arith.constant 0 : i32
    %c0_i32_1 = arith.constant 0 : i32
    return %c0_i32, %c0_i32_0 : i32, i32
  }
  func.func @transform_4(%arg0: i32) -> (i32, i32) {
    %c0_i32 = arith.constant 0 : i32
    %c0_i32_0 = arith.constant 0 : i32
    return %arg0, %c0_i32 : i32, i32
  }
}

</mosaic_0001>

<bundles_post_ra>
// kernel: patch_embed.1
= control target key start
LH: loop header
LB: loop body
LE: loop exit
PB: predicated region body
PF: predicated region fallthrough
CT: control target
= control target key end

     0   :  { %9 = vsyncpa [#allocation3], 0  ;;  %s828_s0 = inlined_call_operand.vmem [shape: f32[32,192], index: 0, kind: input, shape index: {}]   ;;  %s829_s1 = inlined_call_operand.vmem [shape: f32[192,32], index: 1, kind: input, shape index: {}]   ;;  %s830_s2 = inlined_call_operand.vmem [shape: f32[1,32], index: 2, kind: input, shape index: {}]   ;;  %s831_s3 = inlined_call_operand.vmem [shape: f32[16,32], index: 3, kind: input, shape index: {}]   ;;  %s832_s4 = inlined_call_operand.hbm [shape: f32[32,32], index: 4, kind: output, shape index: {}]  }
   0x1   :  { %11 = vsyncpa [#allocation3 + $0x1], 0  ;;  %s615_s15 = smov 0   ;;  %s617_s16 = smov 0  }
   0x2   :  { %s619_s17 = smov 0   ;;  %s621_s18 = smov 0  }
   0x3 LB: > { %s636_s19 = sadd.s32 4294967295, %s584_s18   ;;  %s402_s20 = sadd.s32 4294967294, %s584_s18   ;;  %s584_s18 = sphi %s621_s18, %s838_s18   ;;  %s580_s17 = sphi %s619_s17, %s837_s17   ;;  %s576_s16 = sphi %s617_s16, %s836_s16   ;;  %s572_s15 = sphi %s615_s15, %s835_s15  }
   0x4   : > { %s640_s21 = sadd.s32 1, %s584_s18   ;;  %s113_s22 = sadd.s32 1, %s580_s17 }
   0x5   : > { %s110_s23 = ssub.s32 %s584_s18, %s640_s21  ;;  %p123_p0 = scmp.ne.s32.totalorder %s580_s17, %s576_s16 }
   0x6   : > { %p111_p1 = scmp.eq.s32.totalorder %s110_s23, 0  ;;  %p124_p2 = scmp.eq.s32.totalorder %s636_s19, 1 }
   0x7   : > { %p129_p3 = scmp.ne.s32.totalorder %s576_s16, %s572_s15  ;;  %p130_p4 = scmp.eq.s32.totalorder %s402_s20, 1 }
   0x8   : > { %s651_s24 = scalar_select %p111_p1, %s580_s17, %s113_s22  }
   0x9   : > { %p653_p5 = por %p124_p2, %p123_p0  ;;  %p657_p6 = por %p130_p4, %p129_p3 }
   0xa   : > { %p405_p7 = scmp.ge.s32.totalorder %s584_s18, 1  ;;  %p167_p8 = scmp.lt.s32.totalorder %s584_s18, 3 }
   0xc   : > { %p168_p9 = pnand %p405_p7, %p167_p8 }
   0xd   : > { %v206_v0 = vld [vmem:[%s829_s1] sm:$0xff] (!%p168_p9)  ;;  %v207_v1 = vld [vmem:[%s829_s1 + $0x8] sm:$0xff] (!%p168_p9)  ;;  %v208_v2 = vld [vmem:[%s829_s1 + $0x10] sm:$0xff] (!%p168_p9)  ;;  %s407_s7 = sshll.u32 (!%p168_p9), %s636_s19, 1  ;;  %v586_v3 = vmov (!%p168_p9), 0.0|0.0   ;;  %vm237_vm0 = vcmask (!%p168_p9), 523264  }
   0xe   : > { %171 = sbr.rel (%p168_p9) target bundleno = 294 (0x126), region = 36  ;;  %420 = vmatprep.subr.bf16.mxu0 (!%p168_p9), %v586_v3  ;;  %456 = vmatprep.subr.bf16.mxu1 (!%p168_p9), %v586_v3  ;;  %v421_v4 = vpack.c.bf16 (!%p168_p9), %v207_v1, %v206_v0  ;;  %v209_v5 = vld [vmem:[%s829_s1 + $0x18] sm:$0xff] (!%p168_p9)  ;;  %p195_p10 = scmp.lt.s32.totalorder (!%p168_p9), %s407_s7, 3  ;;  %v210_v7 = vld [vmem:[%s829_s1 + $0x20] sm:$0xff] (!%p168_p9)  ;;  %v211_v8 = vld [vmem:[%s829_s1 + $0x28] sm:$0xff] (!%p168_p9)  ;;  %vm323_vm1 = vcmask (!%p168_p9), 261120  }
   0xf   : > { %v424_v6 = vpack.c.bf16 (!%p168_p9), %v209_v5, %v208_v2  ;;  %v427_v9 = vpack.c.bf16 (!%p168_p9), %v211_v8, %v210_v7  ;;  %v212_v10 = vld [vmem:[%s829_s1 + $0x30] sm:$0xff] (!%p168_p9)  ;;  %v213_v11 = vld [vmem:[%s829_s1 + $0x38] sm:$0xff] (!%p168_p9)  ;;  %v214_v15 = vld [vmem:[%s829_s1 + $0x40] sm:$0xff] (!%p168_p9)  ;;  %s191_s5 = sand.u32 (!%p168_p9), 1, %s576_s16   ;;  %s419_s11 = sshll.u32 (!%p168_p9), %s636_s19, 8 }
  0x10   : > { %422 = vmatpush1.bf16.msra.mxu0 (!%p168_p9), %v421_v4  ;;  %468 = vmatpush1.bf16.msra.mxu1 (!%p168_p9), %v421_v4  ;;  %v430_v14 = vpack.c.bf16 (!%p168_p9), %v213_v11, %v212_v10  ;;  %v215_v16 = vld [vmem:[%s829_s1 + $0x48] sm:$0xff] (!%p168_p9)  ;;  %v216_v18 = vld [vmem:[%s829_s1 + $0x50] sm:$0xff] (!%p168_p9)  ;;  %v217_v19 = vld [vmem:[%s829_s1 + $0x58] sm:$0xff] (!%p168_p9)  ;;  %s406_s6 = sshll.u32 (!%p168_p9), %s191_s5, 4  ;;  %s783_s19 = scalar_lea.hbm (!%p168_p9), %s832_s4, %s419_s11 }
  0x11   : > { %423 = vmatprep.subr.bf16.mxu0 (!%p168_p9), %v586_v3  ;;  %457 = vmatprep.subr.bf16.mxu1 (!%p168_p9), %v586_v3  ;;  %v433_v17 = vpack.c.bf16 (!%p168_p9), %v215_v16, %v214_v15  ;;  %v436_v20 = vpack.c.bf16 (!%p168_p9), %v217_v19, %v216_v18  ;;  %v218_v21 = vld [vmem:[%s829_s1 + $0x60] sm:$0xff] (!%p168_p9)  ;;  %v219_v22 = vld [vmem:[%s829_s1 + $0x68] sm:$0xff] (!%p168_p9)  ;;  %v220_v24 = vld [vmem:[%s829_s1 + $0x70] sm:$0xff] (!%p168_p9)  ;;  %s193_s9 = scalar_lea.vmem (!%p168_p9), [#allocation2], %s406_s6  ;;  %s787_s27 = scalar_lea.sflag (!%p168_p9), [#allocation3], %s191_s5 }
  0x12   : > { %v439_v23 = vpack.c.bf16 (!%p168_p9), %v219_v22, %v218_v21  ;;  %v221_v25 = vld [vmem:[%s829_s1 + $0x78] sm:$0xff] (!%p168_p9)  ;;  %v222_v27 = vld [vmem:[%s829_s1 + $0x80] sm:$0xff] (!%p168_p9)  ;;  %v223_v28 = vld [vmem:[%s829_s1 + $0x88] sm:$0xff] (!%p168_p9)  ;;  %s340_s10 = sshll.u32 (!%p168_p9), %s193_s9, 4  ;;  %s587_s29 = smov (!%p168_p9), [#allocation2]   ;;  %s785_s10 = int_to_ptr.vmem [resolvable:$true] %s340_s10 }
  0x13   : > { %v442_v26 = vpack.c.bf16 (!%p168_p9), %v221_v25, %v220_v24  ;;  %v445_v29 = vpack.c.bf16 (!%p168_p9), %v223_v28, %v222_v27  ;;  %v224_v30 = vld [vmem:[%s829_s1 + $0x90] sm:$0xff] (!%p168_p9)  ;;  %v225_v31 = vld [vmem:[%s829_s1 + $0x98] sm:$0xff] (!%p168_p9)  ;;  %v226_v33 = vld [vmem:[%s829_s1 + $0xa0] sm:$0xff] (!%p168_p9)  ;;  %s522_s28 = scalar_lea.vmem (!%p168_p9), %s785_s10, 256  ;;  %s526_s30 = sshll.u32 (!%p168_p9), %s587_s29, 4  ;;  %s527_s30 = int_to_ptr.vmem [resolvable:$false] %s526_s30 }
  0x14   : > { %425 = vmatpush1.bf16.msra.mxu0 (!%p168_p9), %v424_v6  ;;  %469 = vmatpush1.bf16.msra.mxu1 (!%p168_p9), %v424_v6  ;;  %v448_v32 = vpack.c.bf16 (!%p168_p9), %v225_v31, %v224_v30  ;;  %v227_v34 = vld [vmem:[%s829_s1 + $0xa8] sm:$0xff] (!%p168_p9)  ;;  %v228_v36 = vld [vmem:[%s829_s1 + $0xb0] sm:$0xff] (!%p168_p9)  ;;  %v229_v37 = vld [vmem:[%s829_s1 + $0xb8] sm:$0xff] (!%p168_p9)  ;;  %p523_p11 = scmp.ne.s32.totalorder (!%p168_p9), %s785_s10, %s522_s28  ;;  %s528_s6 = scalar_lea.vmem (!%p168_p9), %s527_s30, 512 }
  0x15   : > { %s840_s7 = smov (!%p195_p10, %s407_s7), 3  ;;  %426 = vmatprep.subr.bf16.mxu0 %v586_v3  ;;  %458 = vmatprep.subr.bf16.mxu1 %v586_v3  ;;  %v451_v35 = vpack.c.bf16 %v227_v34, %v226_v33  ;;  %v454_v38 = vpack.c.bf16 %v229_v37, %v228_v36  ;;  %v410_v41 = vld [vmem:[%s830_s2] ss:$0 sm:$0xff]  ;;  %v320_v45 = vld [vmem:[%s831_s3 + $0x8] sm:$0xff]  ;;  %p529_p0 = scmp.lt.s32.totalorder %s785_s10, %s527_s30 }
  0x16   : > { %s418_s14 = sshll.u32 %s840_s7, 4  ;;  %v319_v43 = vld [vmem:[%s831_s3] sm:$0xff]  ;;  %p524_p12 = pnand %p523_p11, %p653_p5 }
  0x17   : > { %s689_s23 = scalar_lea.vmem %s828_s0, %s418_s14  ;;  %p530_p1 = scmp.lt.s32.totalorder %s528_s6, %s522_s28 }
  0x18   : > { %v203_v12 = vld [vmem:[%s689_s23 + $0x8] sm:$0xff]  ;;  %v205_v13 = vld [vmem:[%s689_s23 + $0x18] sm:$0xff]  ;;  %428 = vmatpush1.bf16.msra.mxu0 %v427_v9  ;;  %470 = vmatpush1.bf16.msra.mxu1 %v427_v9  ;;  %v202_v39 = vld [vmem:[%s689_s23] sm:$0xff]  ;;  %p525_p13 = pneg %p524_p12 }
  0x19   : > { %411 = vmatprep.mubr.msk.f32.mxu0 %vm237_vm0, %v203_v12  ;;  %412 = vmatprep.mubr.msk.f32.mxu1 %vm237_vm0, %v205_v13  ;;  %v204_v40 = vld [vmem:[%s689_s23 + $0x10] sm:$0xff]  ;;  %p531_p2 = por %p530_p1, %p529_p0 }
  0x1a   : > { %429 = vmatprep.subr.bf16.mxu0 %v586_v3  ;;  %459 = vmatprep.subr.bf16.mxu1 %v586_v3 }
  0x1b   : > { %p532_p3 = pnand %p531_p2, %p525_p13 }
  0x1c   : > { %431 = vmatpush1.bf16.msra.mxu0 %v430_v14  ;;  %471 = vmatpush1.bf16.msra.mxu1 %v430_v14 }
  0x1d   : > { %432 = vmatprep.subr.bf16.mxu0 %v586_v3  ;;  %460 = vmatprep.subr.bf16.mxu1 %v586_v3 }
  0x20   : > { %434 = vmatpush1.bf16.msra.mxu0 %v433_v17  ;;  %472 = vmatpush1.bf16.msra.mxu1 %v433_v17 }
  0x21   : > { %435 = vmatprep.subr.bf16.mxu0 %v586_v3  ;;  %461 = vmatprep.subr.bf16.mxu1 %v586_v3 }
  0x24   : > { %437 = vmatpush1.bf16.msra.mxu0 %v436_v20  ;;  %473 = vmatpush1.bf16.msra.mxu1 %v436_v20 }
  0x25   : > { %438 = vmatprep.subr.bf16.mxu0 %v586_v3  ;;  %462 = vmatprep.subr.bf16.mxu1 %v586_v3 }
  0x28   : > { %440 = vmatpush1.bf16.msra.mxu0 %v439_v23  ;;  %474 = vmatpush1.bf16.msra.mxu1 %v439_v23 }
  0x29   : > { %441 = vmatprep.subr.bf16.mxu0 %v586_v3  ;;  %463 = vmatprep.subr.bf16.mxu1 %v586_v3 }
  0x2c   : > { %443 = vmatpush1.bf16.msra.mxu0 %v442_v26  ;;  %475 = vmatpush1.bf16.msra.mxu1 %v442_v26 }
  0x2d   : > { %444 = vmatprep.subr.bf16.mxu0 %v586_v3  ;;  %464 = vmatprep.subr.bf16.mxu1 %v586_v3 }
  0x30   : > { %446 = vmatpush1.bf16.msra.mxu0 %v445_v29  ;;  %476 = vmatpush1.bf16.msra.mxu1 %v445_v29 }
  0x31   : > { %447 = vmatprep.subr.bf16.mxu0 %v586_v3  ;;  %465 = vmatprep.subr.bf16.mxu1 %v586_v3 }
  0x34   : > { %449 = vmatpush1.bf16.msra.mxu0 %v448_v32  ;;  %477 = vmatpush1.bf16.msra.mxu1 %v448_v32 }
  0x35   : > { %450 = vmatprep.subr.bf16.mxu0 %v586_v3  ;;  %466 = vmatprep.subr.bf16.mxu1 %v586_v3 }
  0x38   : > { %452 = vmatpush1.bf16.msra.mxu0 %v451_v35  ;;  %478 = vmatpush1.bf16.msra.mxu1 %v451_v35 }
  0x39   : > { %453 = vmatprep.subr.bf16.mxu0 %v586_v3  ;;  %467 = vmatprep.subr.bf16.mxu1 %v586_v3 }
  0x3c   : > { %455 = vmatpush1.bf16.msra.mxu0 %v454_v38  ;;  %479 = vmatpush1.bf16.msra.mxu1 %v454_v38 }
  0x3f   : > { %309 = vmatmul.mubr.f32.vlgmr.msra.gmra.mrb[0].mxu0 %v202_v39  ;;  %314 = vmatmul.mubr.f32.vlgmr.msra.gmra.mrb[0].mxu1 %v204_v40 }
 0x112   : > { %v310_v42 = vpop.f32.mrb[0].mxu0  ;;  %v315_v44 = vpop.f32.mrb[0].mxu1 }
 0x113   : > { %v311_v46 = vadd.f32 %v410_v41, %v310_v42  ;;  %v316_v47 = vadd.f32 %v410_v41, %v315_v44  ;;  %v312_v48 = vpop.f32.mrb[1].mxu0  ;;  %v317_v49 = vpop.f32.mrb[1].mxu1 }
 0x115   : > { %v321_v50 = vadd.f32 %v319_v43, %v311_v46  ;;  %v322_v51 = vadd.f32 %v320_v45, %v316_v47 }
 0x117   : > { %324 = vst.msk [vmem:[%s193_s9] sm:$0xff] %vm323_vm1, %v321_v50  ;;  %325 = vst.msk [vmem:[%s193_s9 + $0x8] sm:$0xff] %vm323_vm1, %v322_v51 }
 0x118   : > { %535 = shalt.err (!%p532_p3)
}
 0x119   : > { %s536_s5 = scalar_lea.hbm %s783_s19, 256  ;;  %s540_s9 = scalar_lea.hbm %s832_s4, 512 }
 0x11a   : > { %p537_p4 = scmp.ne.s32.totalorder %s783_s19, %s536_s5  ;;  %p541_p9 = scmp.lt.u32.totalorder %s783_s19, %s832_s4 }
 0x11b   : > { %p542_p10 = scmp.lt.u32.totalorder %s540_s9, %s536_s5  ;;  %p544_p12 = scmp.lt.u32.totalorder %s536_s5, %s783_s19 }
 0x11c   : > { %p538_p7 = pnand %p537_p4, %p653_p5 }
 0x11d   : > { %p543_p11 = por %p542_p10, %p541_p9 }
 0x11e   : > { %p539_p8 = pneg %p538_p7 }
 0x11f   : > { %p545_p13 = por %p544_p12, %p543_p11 }
 0x121   : > { %p546_p0 = pnand %p545_p13, %p539_p8 }
 0x123   : > { %549 = shalt.err (!%p546_p0)
}
 0x124   : > { %s588_s13 = smov 128   ;;  %s589_s14 = smov 8  }
 0x125   : > { %480 = dma.vmem_to_hbm [thread:$0]  (%p653_p5), %s785_s10, 256, %s783_s19, %s787_s27, %s588_s13, %s588_s13, %s589_s14  }
 0x126 PF: > { %p486_p1 = scmp.ge.s32.totalorder %s584_s18, 2  ;;  %s355_s20 = sand.u32 1, %s572_s15  }
 0x127   : > { %s356_s23 = scalar_lea.sflag [#allocation3], %s355_s20 }
 0x128   : > { %p483_p2 = pnand %p486_p1, %p657_p6 }
 0x12a   : > { %567 = dma.done.wait (!%p483_p2), %s356_s23, 256  }
 0x12b   : > { %569 = vsyncadd (!%p483_p2), %s356_s23, 4294967040  ;;  %p14_p3 = scmp.ge.s32.totalorder %s640_s21, 4   ;;  %s835_s15 = smov %s576_s16 }
 0x12c   : > { %s836_s16 = smov %s580_s17  ;;  %s837_s17 = smov %s651_s24 }
 0x12d   : > { %s838_s18 = smov %s640_s21  ;;  %16 = sbr.rel (!%p14_p3) target bundleno = 3 (0x3), region = 71 }
 0x134   :  { %361 = vsyncpa [#allocation3], 1 }
 0x135   :  { %363 = vsyncpa [#allocation3 + $0x1], 1 }

</bundles_post_ra>
